<compile_context>
chip_gen: v7x
topology: tpu7x:2x2x1
jax: 0.10.0
libtpu: 0.0.40
codegen_flags: <defaults>
</compile_context>

<pallas_src>
import functools

import jax
import jax.numpy as jnp
from jax import lax
from jax.experimental import pallas as pl
from jax.experimental.pallas import tpu as pltpu


# --------------------------------------------------------------------------------------
# tiling helpers
# --------------------------------------------------------------------------------------
def _pick_tile(dim, target, align):
    """Largest tile <= target that evenly divides `dim` and respects TPU alignment.
    Falls back to the full extent (always a legal block)."""
    if dim <= target:
        return dim
    t = (target // align) * align
    while t >= align:
        if dim % t == 0:
            return t
        t -= align
    return dim


# --------------------------------------------------------------------------------------
# Tiled dense (matmul + bias + optional ReLU), bf16 operands / f32 accumulate
# --------------------------------------------------------------------------------------
def _dense_kernel(x_ref, w_ref, b_ref, o_ref, acc_ref, *, act):
    @pl.when(pl.program_id(2) == 0)
    def _():
        acc_ref[...] = jnp.zeros_like(acc_ref)

    acc_ref[...] += jnp.dot(x_ref[...], w_ref[...], preferred_element_type=jnp.float32)

    @pl.when(pl.program_id(2) == pl.num_programs(2) - 1)
    def _():
        y = acc_ref[...] + b_ref[...]
        if act == "relu":
            y = jnp.maximum(y, 0.0)
        o_ref[...] = y.astype(o_ref.dtype)


def pallas_dense(x, w, b=None, act=None, out_dtype=jnp.float32,
                 tm=256, tn=256, tk=512):
    M, K = x.shape
    K2, N = w.shape
    assert K == K2
    if b is None:
        b = jnp.zeros((N,), jnp.float32)
    tm = _pick_tile(M, tm, 8)
    tn = _pick_tile(N, tn, 128)
    tk = _pick_tile(K, tk, 128)
    grid = (M // tm, N // tn, K // tk)
    return pl.pallas_call(
        functools.partial(_dense_kernel, act=act),
        out_shape=jax.ShapeDtypeStruct((M, N), out_dtype),
        grid_spec=pltpu.PrefetchScalarGridSpec(
            num_scalar_prefetch=0,
            grid=grid,
            in_specs=[
                pl.BlockSpec((tm, tk), lambda i, j, k: (i, k)),
                pl.BlockSpec((tk, tn), lambda i, j, k: (k, j)),
                pl.BlockSpec((1, tn), lambda i, j, k: (0, j)),
            ],
            out_specs=pl.BlockSpec((tm, tn), lambda i, j, k: (i, j)),
            scratch_shapes=[pltpu.VMEM((tm, tn), jnp.float32)],
        ),
        compiler_params=pltpu.CompilerParams(
            dimension_semantics=("parallel", "parallel", "arbitrary")),
    )(x.astype(jnp.bfloat16), w.astype(jnp.bfloat16),
      b.reshape(1, N).astype(jnp.float32))


# --------------------------------------------------------------------------------------
# Fused multi-head attention: fused-QKV tile in, all heads per grid step,
# fused Wo projection + bias + optional residual.  One grid step per sequence.
# --------------------------------------------------------------------------------------
def _attn_kernel(qkv_ref, wo_ref, bo_ref, *rest, scale, n_head, d_model, has_residual):
    if has_residual:
        res_ref, o_ref = rest
    else:
        (o_ref,) = rest

    D = d_model
    Dh = D // n_head
    qkv = qkv_ref[...]                                       # [S, 3D] bf16

    heads = []
    for h in range(n_head):                                  # unrolled; heads batched per step
        q = qkv[:, h * Dh:(h + 1) * Dh]
        k = qkv[:, D + h * Dh:D + (h + 1) * Dh]
        v = qkv[:, 2 * D + h * Dh:2 * D + (h + 1) * Dh]
        # q @ k^T without materializing a transpose
        s = lax.dot_general(q, k, (((1,), (1,)), ((), ())),
                            preferred_element_type=jnp.float32) * scale
        s = s - jnp.max(s, axis=-1, keepdims=True)
        p = jnp.exp(s)
        p = p * pl.reciprocal(jnp.sum(p, axis=-1, keepdims=True), approx=True)
        heads.append(lax.dot_general(p.astype(v.dtype), v, (((1,), (0,)), ((), ())),
                                     preferred_element_type=jnp.float32))
    attn = jnp.concatenate(heads, axis=-1)                   # [S, D] f32

    y = jnp.dot(attn.astype(jnp.bfloat16), wo_ref[...],
                preferred_element_type=jnp.float32) + bo_ref[...]
    if has_residual:
        y = y + res_ref[...]
    o_ref[...] = y.astype(o_ref.dtype)


def pallas_attention(qkv, wo, bo, n_head, residual=None):
    """qkv: [B, S, 3D] (fused Q|K|V), wo: [D, D], bo: [D]; optional residual [B, S, D]."""
    B, S, D3 = qkv.shape
    D = D3 // 3
    Dh = D // n_head
    scale = 1.0 / float(Dh) ** 0.5
    has_res = residual is not None

    seq3_spec = pl.BlockSpec((pl.Squeezed(), S, D3), lambda b: (b, 0, 0))
    seq_spec = pl.BlockSpec((pl.Squeezed(), S, D), lambda b: (b, 0, 0))

    in_specs = [seq3_spec,
                pl.BlockSpec((D, D), lambda b: (0, 0)),
                pl.BlockSpec((1, D), lambda b: (0, 0))]
    args = [qkv.astype(jnp.bfloat16), wo.astype(jnp.bfloat16),
            bo.reshape(1, D).astype(jnp.float32)]
    if has_res:
        in_specs.append(seq_spec)
        args.append(residual.astype(jnp.float32))

    return pl.pallas_call(
        functools.partial(_attn_kernel, scale=scale, n_head=n_head,
                          d_model=D, has_residual=has_res),
        out_shape=jax.ShapeDtypeStruct((B, S, D), jnp.float32),
        grid_spec=pltpu.PrefetchScalarGridSpec(
            num_scalar_prefetch=0, grid=(B,),
            in_specs=in_specs, out_specs=seq_spec),
        compiler_params=pltpu.CompilerParams(dimension_semantics=("parallel",)),
    )(*args)


# --------------------------------------------------------------------------------------
# Fused feed-forward block: (x + patch_token) + FFN(x + patch_token), per patch.
# --------------------------------------------------------------------------------------
def _ffn_kernel(x_ref, po_ref, w1_ref, b1_ref, w2_ref, b2_ref, o_ref):
    x = x_ref[...] + po_ref[...]                             # broadcast patch token [1,D]->[K,D]
    h = jnp.dot(x.astype(jnp.bfloat16), w1_ref[...],
                preferred_element_type=jnp.float32) + b1_ref[...]
    h = jnp.maximum(h, 0.0)
    y = jnp.dot(h.astype(jnp.bfloat16), w2_ref[...],
                preferred_element_type=jnp.float32) + b2_ref[...]
    o_ref[...] = (x + y).astype(o_ref.dtype)


def pallas_ffn(hp, patch_tok, w1, b1, w2, b2):
    Pn, K, D = hp.shape
    Dff = w1.shape[1]
    seq_spec = pl.BlockSpec((pl.Squeezed(), K, D), lambda p: (p, 0, 0))
    po_spec = pl.BlockSpec((pl.Squeezed(), 1, D), lambda p: (p, 0, 0))
    return pl.pallas_call(
        _ffn_kernel,
        out_shape=jax.ShapeDtypeStruct((Pn, K, D), jnp.float32),
        grid_spec=pltpu.PrefetchScalarGridSpec(
            num_scalar_prefetch=0, grid=(Pn,),
            in_specs=[seq_spec, po_spec,
                      pl.BlockSpec((D, Dff), lambda p: (0, 0)),
                      pl.BlockSpec((1, Dff), lambda p: (0, 0)),
                      pl.BlockSpec((Dff, D), lambda p: (0, 0)),
                      pl.BlockSpec((1, D), lambda p: (0, 0))],
            out_specs=seq_spec),
        compiler_params=pltpu.CompilerParams(dimension_semantics=("parallel",)),
    )(hp.astype(jnp.float32), patch_tok.reshape(Pn, 1, D).astype(jnp.float32),
      w1.astype(jnp.bfloat16), b1.reshape(1, Dff).astype(jnp.float32),
      w2.astype(jnp.bfloat16), b2.reshape(1, D).astype(jnp.float32))


# --------------------------------------------------------------------------------------
# Row-tiled soft-target cross-entropy with fused tau scaling.
# --------------------------------------------------------------------------------------
def _soft_ce_kernel(z_ref, t_ref, o_ref, *, tau, inv_n):
    @pl.when(pl.program_id(0) == 0)
    def _():
        o_ref[...] = jnp.zeros_like(o_ref)

    z = z_ref[...] * tau
    t = t_ref[...] * tau
    tshift = t - jnp.max(t, axis=-1, keepdims=True)
    te = jnp.exp(tshift)
    q = te / jnp.sum(te, axis=-1, keepdims=True)             # softmax(t * tau)
    zshift = z - jnp.max(z, axis=-1, keepdims=True)
    lse = jnp.log(jnp.sum(jnp.exp(zshift), axis=-1, keepdims=True))
    logp = zshift - lse                                      # log_softmax(z * tau)
    loss = jnp.sum(q * logp)                                 # scalar partial sum
    o_ref[...] = o_ref[...] - loss * inv_n


def pallas_soft_cross_entropy(z, t, tau):
    N, C = z.shape
    tm = _pick_tile(N, 512, 8)
    out = pl.pallas_call(
        functools.partial(_soft_ce_kernel, tau=float(tau), inv_n=1.0 / float(N)),
        out_shape=jax.ShapeDtypeStruct((1, 1), jnp.float32),
        grid_spec=pltpu.PrefetchScalarGridSpec(
            num_scalar_prefetch=0, grid=(N // tm,),
            in_specs=[pl.BlockSpec((tm, C), lambda i: (i, 0)),
                      pl.BlockSpec((tm, C), lambda i: (i, 0))],
            out_specs=pl.BlockSpec((1, 1), lambda i: (0, 0))),
        compiler_params=pltpu.CompilerParams(dimension_semantics=("arbitrary",)),
    )(z.astype(jnp.float32), t.astype(jnp.float32))
    return out[0, 0]


# --------------------------------------------------------------------------------------
# CoBFormer forward (GNN branch + BGA branch + co-training loss)
# --------------------------------------------------------------------------------------
def gcn_forward(x, adj, params):
    # GCNConv: A_hat @ (X W) + b; ReLU between layers, no act on output.
    t = pallas_dense(x, params["gcn_w1"], out_dtype=jnp.bfloat16)
    h = pallas_dense(adj, t, params["gcn_b1"], act="relu")
    t = pallas_dense(h, params["gcn_w2"], out_dtype=jnp.bfloat16)
    z1 = pallas_dense(adj, t, params["gcn_b2"])
    return z1


def bga_forward(x, patch, params, n_head):
    # TODO(synk): LayerNorm / dropout of the original BGA layer are omitted; one BGA layer used.
    N, _ = x.shape
    P, K = patch.shape
    D = params["bga_w_in"].shape[1]

    # Gather nodes into patch order first (linear layers are row-wise, so this commutes).
    # TODO(synk): could be folded into the projection kernel via PrefetchScalarGridSpec row gather.
    patch_flat = patch.reshape(-1)
    xp = x[patch_flat]                                                   # [P*K, F]

    hp_flat = pallas_dense(xp, params["bga_w_in"], params["bga_b_in"], act="relu")   # [P*K, D]

    # ---- node-level (intra-patch) attention: fused QKV + per-patch attention + Wo + residual
    w_qkv_n = jnp.concatenate([params["wq_n"], params["wk_n"], params["wv_n"]], axis=1)
    b_qkv_n = jnp.concatenate([params["bq_n"], params["bk_n"], params["bv_n"]], axis=0)
    qkv_n = pallas_dense(hp_flat, w_qkv_n, b_qkv_n, out_dtype=jnp.bfloat16)          # [P*K, 3D]

    hp = pallas_attention(qkv_n.reshape(P, K, 3 * D), params["wo_n"], params["bo_n"],
                          n_head, residual=hp_flat.reshape(P, K, D))                  # [P, K, D]

    # ---- patch-level (inter-patch) attention on mean-pooled patch tokens ----
    tok = jnp.mean(hp, axis=1)                                                        # [P, D]
    w_qkv_p = jnp.concatenate([params["wq_p"], params["wk_p"], params["wv_p"]], axis=1)
    b_qkv_p = jnp.concatenate([params["bq_p"], params["bk_p"], params["bv_p"]], axis=0)
    qkv_p = pallas_dense(tok, w_qkv_p, b_qkv_p, out_dtype=jnp.bfloat16)               # [P, 3D]
    patch_out = pallas_attention(qkv_p.reshape(1, P, 3 * D),
                                 params["wo_p"], params["bo_p"], n_head)              # [1, P, D]
    patch_out = patch_out.reshape(P, D)

    # ---- fused feed-forward (+ patch-token broadcast + residual) ----
    flat = pallas_ffn(hp, patch_out, params["w_ff1"], params["b_ff1"],
                      params["w_ff2"], params["b_ff2"]).reshape(P * K, D)

    # classification head in patch order, then un-permute back to node order (cheap, dim_out wide)
    logits_p = pallas_dense(flat, params["w_cls"], params["b_cls"])                   # [P*K, dim_out]
    inv_perm = jnp.argsort(patch_flat)
    z2 = logits_p[inv_perm]                                                           # [N, dim_out]
    return z2


def cobformer_forward(x, adj, patch, y, mask, params, alpha, tau, n_head):
    z1 = gcn_forward(x, adj, params)
    z2 = bga_forward(x, patch, params, n_head)

    l12 = pallas_soft_cross_entropy(z1, z2, tau)
    l21 = pallas_soft_cross_entropy(z2, z1, tau)
    extra_loss = (l12 + l21) * (1.0 - alpha) / alpha

    pred = z2[mask]
    true = y[mask] if y is not None else None
    return pred, true, extra_loss


# --------------------------------------------------------------------------------------
# Deterministic setup + run
# --------------------------------------------------------------------------------------
if __name__ == "__main__":
    N, DIM_IN, HID, DIM_OUT = 64, 16, 32, 8
    P, K, H = 8, 8, 2
    ALPHA, TAU = 0.8, 0.5

    key = jax.random.PRNGKey(0)
    keys = jax.random.split(key, 8)

    x = jax.random.normal(keys[0], (N, DIM_IN), jnp.float32)
    y = jax.random.randint(keys[1], (N,), 0, DIM_OUT)

    # ring graph + self loops, symmetric normalization A_hat = D^-1/2 (A + I) D^-1/2
    idx = jnp.arange(N)
    A = jnp.zeros((N, N), jnp.float32)
    A = A.at[idx, (idx + 1) % N].set(1.0)
    A = A.at[(idx + 1) % N, idx].set(1.0)
    A = A + jnp.eye(N, dtype=jnp.float32)
    dinv = 1.0 / jnp.sqrt(jnp.sum(A, axis=1))
    adj = A * dinv[:, None] * dinv[None, :]

    # patches: deterministic permutation of nodes into P patches of K nodes each
    patch = jax.random.permutation(keys[2], N).reshape(P, K)

    # "train" split mask
    mask = jnp.arange(N) < N // 2

    def winit(k, shape, scale=0.1):
        return scale * jax.random.normal(k, shape, jnp.float32)

    pk = jax.random.split(keys[3], 20)
    z32 = jnp.zeros((HID,), jnp.float32)
    params = {
        # GNN branch (2 GCN layers)
        "gcn_w1": winit(pk[0], (DIM_IN, HID)), "gcn_b1": z32,
        "gcn_w2": winit(pk[1], (HID, DIM_OUT)), "gcn_b2": jnp.zeros((DIM_OUT,), jnp.float32),
        # BGA branch
        "bga_w_in": winit(pk[2], (DIM_IN, HID)), "bga_b_in": z32,
        "wq_n": winit(pk[3], (HID, HID)), "bq_n": z32,
        "wk_n": winit(pk[4], (HID, HID)), "bk_n": z32,
        "wv_n": winit(pk[5], (HID, HID)), "bv_n": z32,
        "wo_n": winit(pk[6], (HID, HID)), "bo_n": z32,
        "wq_p": winit(pk[7], (HID, HID)), "bq_p": z32,
        "wk_p": winit(pk[8], (HID, HID)), "bk_p": z32,
        "wv_p": winit(pk[9], (HID, HID)), "bv_p": z32,
        "wo_p": winit(pk[10], (HID, HID)), "bo_p": z32,
        "w_ff1": winit(pk[11], (HID, 2 * HID)), "b_ff1": jnp.zeros((2 * HID,), jnp.float32),
        "w_ff2": winit(pk[12], (2 * HID, HID)), "b_ff2": z32,
        "w_cls": winit(pk[13], (HID, DIM_OUT)), "b_cls": jnp.zeros((DIM_OUT,), jnp.float32),
    }

    pred, true, extra_loss = cobformer_forward(
        x, adj, patch, y, mask, params, ALPHA, TAU, H
    )
    jax.block_until_ready((pred, true, extra_loss))
    assert pred.shape == (N // 2, DIM_OUT)
    assert true.shape == (N // 2,)
    assert jnp.isfinite(extra_loss)
    print("KERNEL_OK")
</pallas_src>

<mosaic_0001>
module attributes {stable_mosaic.version = 11 : i64} {
  func.func @_dense_kernel(%arg0: i32, %arg1: i32, %arg2: i32, %arg3: memref<64x16xbf16, #tpu.memory_space<vmem>>, %arg4: memref<16x32xbf16, #tpu.memory_space<vmem>>, %arg5: memref<1x32xf32, #tpu.memory_space<vmem>>, %arg6: memref<64x32xbf16, #tpu.memory_space<vmem>>, %arg7: memref<64x32xf32, #tpu.memory_space<vmem>>) attributes {dimension_semantics = [#tpu.dimension_semantics<parallel>, #tpu.dimension_semantics<parallel>, #tpu.dimension_semantics<arbitrary>], iteration_bounds = array<i64: 1, 1, 1>, scalar_prefetch = 0 : i64, scratch_operands = 1 : i64, tpu.core_type = #tpu.core_type<tc>, window_params = [{transform_indices = @transform_0, window_bounds = array<i64: 64, 16>}, {transform_indices = @transform_1, window_bounds = array<i64: 16, 32>}, {transform_indices = @transform_2, window_bounds = array<i64: 1, 32>}, {transform_indices = @transform_3, window_bounds = array<i64: 64, 32>}]} {
    %c0_i32 = arith.constant 0 : i32
    %0 = arith.cmpi eq, %arg2, %c0_i32 : i32
    %1 = arith.extui %0 : i1 to i32
    %c0_i32_0 = arith.constant 0 : i32
    %2 = arith.cmpi ne, %1, %c0_i32_0 : i32
    scf.if %2 {
      %cst_10 = arith.constant 0.000000e+00 : f32
      %12 = vector.broadcast %cst_10 : f32 to vector<64x32xf32>
      %c0_11 = arith.constant 0 : index
      %c0_12 = arith.constant 0 : index
      %13 = vector.load %arg7[%c0_11, %c0_12] : memref<64x32xf32, #tpu.memory_space<vmem>>, vector<64x32xf32>
      tpu.vector_store %arg7[%c0_11, %c0_12], %12 {strides = array<i32>} : memref<64x32xf32, #tpu.memory_space<vmem>>, vector<64x32xf32>,
    } else {
    }
    %c0 = arith.constant 0 : index
    %c0_1 = arith.constant 0 : index
    %3 = vector.load %arg7[%c0, %c0_1] : memref<64x32xf32, #tpu.memory_space<vmem>>, vector<64x32xf32>
    %c0_2 = arith.constant 0 : index
    %c0_3 = arith.constant 0 : index
    %4 = vector.load %arg3[%c0_2, %c0_3] : memref<64x16xbf16, #tpu.memory_space<vmem>>, vector<64x16xbf16>
    %c0_4 = arith.constant 0 : index
    %c0_5 = arith.constant 0 : index
    %5 = vector.load %arg4[%c0_4, %c0_5] : memref<16x32xbf16, #tpu.memory_space<vmem>>, vector<16x32xbf16>
    %cst = arith.constant dense<0.000000e+00> : vector<64x32xf32>
    %6 = tpu.matmul %4, %5, %cst {dimension_numbers = #tpu.dot_dimension_numbers<[1], [0], [0], [1], [0, 0, 1, 1], [], []>} : vector<64x16xbf16>, vector<16x32xbf16>, vector<64x32xf32> -> vector<64x32xf32>
    %7 = arith.addf %3, %6 : vector<64x32xf32>
    %c0_6 = arith.constant 0 : index
    %c0_7 = arith.constant 0 : index
    %8 = vector.load %arg7[%c0_6, %c0_7] : memref<64x32xf32, #tpu.memory_space<vmem>>, vector<64x32xf32>
    tpu.vector_store %arg7[%c0_6, %c0_7], %7 {strides = array<i32>} : memref<64x32xf32, #tpu.memory_space<vmem>>, vector<64x32xf32>,
    %c0_i32_8 = arith.constant 0 : i32
    %9 = arith.cmpi eq, %arg2, %c0_i32_8 : i32
    %10 = arith.extui %9 : i1 to i32
    %c0_i32_9 = arith.constant 0 : i32
    %11 = arith.cmpi ne, %10, %c0_i32_9 : i32
    scf.if %11 {
      %c0_10 = arith.constant 0 : index
      %c0_11 = arith.constant 0 : index
      %12 = vector.load %arg7[%c0_10, %c0_11] : memref<64x32xf32, #tpu.memory_space<vmem>>, vector<64x32xf32>
      %c0_12 = arith.constant 0 : index
      %c0_13 = arith.constant 0 : index
      %13 = vector.load %arg5[%c0_12, %c0_13] : memref<1x32xf32, #tpu.memory_space<vmem>>, vector<1x32xf32>
      %14 = vector.broadcast %13 : vector<1x32xf32> to vector<64x32xf32>
      %15 = arith.addf %12, %14 : vector<64x32xf32>
      %16 = arith.truncf %15 : vector<64x32xf32> to vector<64x32xbf16>
      %c0_14 = arith.constant 0 : index
      %c0_15 = arith.constant 0 : index
      %17 = vector.load %arg6[%c0_14, %c0_15] : memref<64x32xbf16, #tpu.memory_space<vmem>>, vector<64x32xbf16>
      tpu.vector_store %arg6[%c0_14, %c0_15], %16 {strides = array<i32>} : memref<64x32xbf16, #tpu.memory_space<vmem>>, vector<64x32xbf16>,
    } else {
    }
    return
  }
  func.func @transform_0(%arg0: i32, %arg1: i32, %arg2: i32) -> (i32, i32) {
    %c0_i32 = arith.constant 0 : i32
    return %arg0, %arg2 : i32, i32
  }
  func.func @transform_1(%arg0: i32, %arg1: i32, %arg2: i32) -> (i32, i32) {
    %c0_i32 = arith.constant 0 : i32
    return %arg2, %arg1 : i32, i32
  }
  func.func @transform_2(%arg0: i32, %arg1: i32, %arg2: i32) -> (i32, i32) {
    %c0_i32 = arith.constant 0 : i32
    %c0_i32_0 = arith.constant 0 : i32
    return %c0_i32, %arg1 : i32, i32
  }
  func.func @transform_3(%arg0: i32, %arg1: i32, %arg2: i32) -> (i32, i32) {
    %c0_i32 = arith.constant 0 : i32
    return %arg0, %arg1 : i32, i32
  }
}

</mosaic_0001>

<bundles_post_ra>
// kernel: tpu_custom_call.1
= control target key start
LH: loop header
LB: loop body
LE: loop exit
PB: predicated region body
PF: predicated region fallthrough
CT: control target
= control target key end

     0   :  { %vm19_vm0 = vcmask 261120   ;;  %v287_v1 = vmov 0.0   ;;  %vm72_vm1 = vcmask 130048   ;;  %vm225_vm2 = vcmask 257024   ;;  %s374_s1 = inlined_call_operand.vmem [shape: bf16[16,32], index: 1, kind: input, shape index: {}]   ;;  %s375_s0 = inlined_call_operand.vmem [shape: bf16[64,16], index: 0, kind: input, shape index: {}]   ;;  %s376_s2 = inlined_call_operand.vmem [shape: f32[1,32], index: 2, kind: input, shape index: {}]   ;;  %s377_s3 = inlined_call_operand.vmem [shape: bf16[64,32], index: 3, kind: output, shape index: {}]  }
   0x1   :  { %v282_v0 = vld [vmem:[%s374_s1] sm:$0xff]   ;;  %22 = vst.msk [vmem:[#allocation2 + $0x10] sm:$0xff] %vm19_vm0, %v287_v1  ;;  %20 = vst.msk [vmem:[#allocation2] sm:$0xff] %vm19_vm0, %v287_v1  ;;  %v284_v3 = vld [vmem:[%s375_s0 + $0x10] sm:$0xff]  }
   0x2   :  { %21 = vst.msk [vmem:[#allocation2 + $0x8] sm:$0xff] %vm19_vm0, %v287_v1  ;;  %23 = vst.msk [vmem:[#allocation2 + $0x18] sm:$0xff] %vm19_vm0, %v287_v1  ;;  %v283_v2 = vld [vmem:[%s375_s0] sm:$0xff]   ;;  %269 = vmatprep.subr.bf16.mxu0 %v282_v0  ;;  %279 = vmatprep.subr.bf16.mxu1 %v282_v0  ;;  %v285_v4 = vld [vmem:[%s375_s0 + $0x8] sm:$0xff]  }
   0x3   :  { %24 = vst.msk [vmem:[#allocation2 + $0x20] sm:$0xff] %vm19_vm0, %v287_v1  ;;  %25 = vst.msk [vmem:[#allocation2 + $0x28] sm:$0xff] %vm19_vm0, %v287_v1  ;;  %270 = vmatpush3.bf16.msra.mxu0 %v282_v0  ;;  %280 = vmatpush3.bf16.msra.mxu1 %v282_v0  ;;  %v286_v5 = vld [vmem:[%s375_s0 + $0x18] sm:$0xff]   ;;  %v247_v30 = vld [vmem:[%s376_s2] ss:$0 sm:$0xff] }
   0x4   :  { %26 = vst.msk [vmem:[#allocation2 + $0x30] sm:$0xff] %vm19_vm0, %v287_v1  ;;  %27 = vst.msk [vmem:[#allocation2 + $0x38] sm:$0xff] %vm19_vm0, %v287_v1  ;;  %271 = vmatprep.mubr.msk.bf16.mxu0 %vm72_vm1, %v283_v2  ;;  %275 = vmatprep.mubr.msk.bf16.mxu1 %vm72_vm1, %v284_v3 }
   0x6   :  { %272 = vmatmul.mubr.msk.bf16.vlgmr.msra.gmra.mrb[0].mxu0 %vm72_vm1, %v285_v4  ;;  %276 = vmatmul.mubr.msk.bf16.vlgmr.msra.gmra.mrb[0].mxu1 %vm72_vm1, %v286_v5 }
   0x8   :  { %v30_v6 = vld [vmem:[#allocation2 + $0x10] sm:$0xff]  ;;  %v28_v8 = vld [vmem:[#allocation2] sm:$0xff] }
   0x9   :  { %v31_v12 = vld [vmem:[#allocation2 + $0x18] sm:$0xff]  ;;  %v29_v18 = vld [vmem:[#allocation2 + $0x8] sm:$0xff] }
   0xa   :  { %v32_v9 = vld [vmem:[#allocation2 + $0x20] sm:$0xff]  ;;  %v33_v19 = vld [vmem:[#allocation2 + $0x28] sm:$0xff] }
   0xb   :  { %v34_v7 = vld [vmem:[#allocation2 + $0x30] sm:$0xff]  ;;  %v35_v13 = vld [vmem:[#allocation2 + $0x38] sm:$0xff] }
  0xd9   :  { %v273_v10 = vpop.f32.mrb[0].mxu0  ;;  %v277_v11 = vpop.f32.mrb[0].mxu1 }
  0xda   :  { %v152_v14 = vadd.f32 %v273_v10, %v30_v6  ;;  %v156_v15 = vadd.f32 %v277_v11, %v34_v7  ;;  %v119_v16 = vpop.f32.mrb[1].mxu0  ;;  %v135_v17 = vpop.f32.mrb[1].mxu1 }
  0xdb   :  { %v150_v20 = vadd.f32 %v119_v16, %v28_v8  ;;  %v154_v21 = vadd.f32 %v135_v17, %v32_v9  ;;  %v274_v22 = vpop.f32.mrb[2].mxu0  ;;  %v278_v23 = vpop.f32.mrb[2].mxu1 }
  0xdc   :  { %161 = vst.msk [vmem:[#allocation2 + $0x10] sm:$0xff] %vm19_vm0, %v152_v14  ;;  %165 = vst.msk [vmem:[#allocation2 + $0x30] sm:$0xff] %vm19_vm0, %v156_v15  ;;  %v153_v24 = vadd.f32 %v274_v22, %v31_v12  ;;  %v157_v25 = vadd.f32 %v278_v23, %v35_v13  ;;  %v122_v26 = vpop.f32.mrb[3].mxu0  ;;  %v138_v27 = vpop.f32.mrb[3].mxu1 }
  0xdd   :  { %159 = vst.msk [vmem:[#allocation2] sm:$0xff] %vm19_vm0, %v150_v20  ;;  %163 = vst.msk [vmem:[#allocation2 + $0x20] sm:$0xff] %vm19_vm0, %v154_v21  ;;  %v151_v28 = vadd.f32 %v122_v26, %v29_v18  ;;  %v155_v29 = vadd.f32 %v138_v27, %v33_v19 }
  0xde   :  { %162 = vst.msk [vmem:[#allocation2 + $0x18] sm:$0xff] %vm19_vm0, %v153_v24  ;;  %166 = vst.msk [vmem:[#allocation2 + $0x38] sm:$0xff] %vm19_vm0, %v157_v25 }
  0xdf   :  { %160 = vst.msk [vmem:[#allocation2 + $0x8] sm:$0xff] %vm19_vm0, %v151_v28  ;;  %164 = vst.msk [vmem:[#allocation2 + $0x28] sm:$0xff] %vm19_vm0, %v155_v29 }
  0xe3   :  { %v172_v31 = vld [vmem:[#allocation2 + $0x10] sm:$0xff] }
  0xe4   :  { %v176_v32 = vld [vmem:[#allocation2 + $0x30] sm:$0xff]  ;;  %v187_v33 = vadd.f32 %v247_v30, %v172_v31  ;;  %v170_v35 = vld [vmem:[#allocation2] sm:$0xff] }
  0xe5   :  { %v191_v34 = vadd.f32 %v247_v30, %v176_v32  ;;  %v174_v36 = vld [vmem:[#allocation2 + $0x20] sm:$0xff]  ;;  %v185_v37 = vadd.f32 %v247_v30, %v170_v35  ;;  %v173_v39 = vld [vmem:[#allocation2 + $0x18] sm:$0xff] }
  0xe6   :  { %v189_v38 = vadd.f32 %v247_v30, %v174_v36  ;;  %v177_v40 = vld [vmem:[#allocation2 + $0x38] sm:$0xff]  ;;  %v258_v41 = vpack.c.bf16 %v187_v33, %v187_v33  ;;  %v188_v43 = vadd.f32 %v247_v30, %v173_v39  ;;  %v171_v45 = vld [vmem:[#allocation2 + $0x8] sm:$0xff] }
  0xe7   :  { %v262_v42 = vpack.c.bf16 %v191_v34, %v191_v34  ;;  %v192_v44 = vadd.f32 %v247_v30, %v177_v40  ;;  %v175_v46 = vld [vmem:[#allocation2 + $0x28] sm:$0xff]  ;;  %v256_v47 = vpack.c.bf16 %v185_v37, %v185_v37  ;;  %v186_v49 = vadd.f32 %v247_v30, %v171_v45 }
  0xe8   :  { %v260_v48 = vpack.c.bf16 %v189_v38, %v189_v38  ;;  %v190_v50 = vadd.f32 %v247_v30, %v175_v46  ;;  %228 = vst.msk [vmem:[%s377_s3 + $0x8] sm:$0xf] %vm225_vm2, %v258_v41  ;;  %v259_v51 = vpack.c.bf16 %v188_v43, %v188_v43 }
  0xe9   :  { %232 = vst.msk [vmem:[%s377_s3 + $0x18] sm:$0xf] %vm225_vm2, %v262_v42  ;;  %v263_v52 = vpack.c.bf16 %v192_v44, %v192_v44  ;;  %226 = vst.msk [vmem:[%s377_s3] sm:$0xf] %vm225_vm2, %v256_v47  ;;  %v257_v53 = vpack.c.bf16 %v186_v49, %v186_v49 }
  0xea   :  { %230 = vst.msk [vmem:[%s377_s3 + $0x10] sm:$0xf] %vm225_vm2, %v260_v48  ;;  %v261_v54 = vpack.c.bf16 %v190_v50, %v190_v50  ;;  %229 = vst.msk [vmem:[%s377_s3 + $0xc] sm:$0xf] %vm225_vm2, %v259_v51 }
  0xeb   :  { %233 = vst.msk [vmem:[%s377_s3 + $0x1c] sm:$0xf] %vm225_vm2, %v263_v52  ;;  %227 = vst.msk [vmem:[%s377_s3 + $0x4] sm:$0xf] %vm225_vm2, %v257_v53 }
  0xec   :  { %231 = vst.msk [vmem:[%s377_s3 + $0x14] sm:$0xf] %vm225_vm2, %v261_v54 }

</bundles_post_ra>
